<compile_context>
chip_gen: v7x
topology: tpu7x:2x2x1
jax: 0.10.0
libtpu: 0.0.40
codegen_flags: <defaults>
</compile_context>

<pallas_src>
import jax
import jax.numpy as jnp
from jax.experimental import pallas as pl
from jax.experimental.pallas import tpu as pltpu


def mlp_kernel(x_ref, w1_ref, b1_ref, w2_ref, b2_ref, o_ref):
    # x_ref : (1, N_pad)  batch on the lane axis (lane-dense)
    # w1_ref: (H, 1)      per-hidden-unit weight  (n_feature == 1)
    # b1_ref: (H, 1)      per-hidden-unit bias
    # w2_ref: (H, 1)      per-hidden-unit output weight (n_output == 1)
    # b2_ref: (1, 1)      scalar output bias, in SMEM
    # o_ref : (1, N_pad)  lane-dense output
    x = x_ref[...]                                               # (1, Np)
    # Layer 1: outer-product broadcast + bias + ReLU (pure VPU).
    h = jnp.maximum(w1_ref[...] * x + b1_ref[...], 0.0)          # (H, Np)
    # Layer 2: weighted sublane reduction (VPU mul + XLU reduce).
    y = jnp.sum(h * w2_ref[...], axis=0, keepdims=True)          # (1, Np)
    o_ref[...] = y + b2_ref[0, 0]


def net_forward(x, w1, b1, w2, b2):
    """Fused forward of PyTorch Net: relu(x @ W1 + b1) @ W2 + b2.

    x : (N, 1) float32
    w1: (1, H)   b1: (H,)
    w2: (H, 1)   b2: (1,)
    returns (N, 1) float32
    """
    N, F = x.shape
    H = w1.shape[1]
    O = w2.shape[1]
    assert F == 1 and O == 1, "kernel specialized for n_feature=1, n_output=1"

    LANES = 128
    N_pad = ((N + LANES - 1) // LANES) * LANES

    # Lane-dense layout: batch on the 128-lane axis, zero-padded to a full vreg.
    x_lane = jnp.zeros((1, N_pad), jnp.float32).at[0, :N].set(x[:, 0])
    w1_col = w1.reshape(H, 1).astype(jnp.float32)
    b1_col = b1.reshape(H, 1).astype(jnp.float32)
    w2_col = w2.reshape(H, 1).astype(jnp.float32)
    b2_sc = b2.reshape(1, 1).astype(jnp.float32)

    full = lambda shape: pl.BlockSpec(shape, lambda: (0,) * len(shape))

    out = pl.pallas_call(
        mlp_kernel,
        out_shape=jax.ShapeDtypeStruct((1, N_pad), jnp.float32),
        grid=(),
        in_specs=[
            full((1, N_pad)),                                   # x (lane-dense)
            full((H, 1)),                                       # w1
            full((H, 1)),                                       # b1
            full((H, 1)),                                       # w2
            pl.BlockSpec(memory_space=pltpu.MemorySpace.SMEM),  # b2 scalar
        ],
        out_specs=full((1, N_pad)),
    )(x_lane, w1_col, b1_col, w2_col, b2_sc)

    # Drop padding lanes and return in the PyTorch (N, 1) layout.
    return out[0, :N].reshape(N, O)


def net_forward_ref(x, w1, b1, w2, b2):
    h = jnp.maximum(x @ w1 + b1, 0.0)
    return h @ w2 + b2


if __name__ == "__main__":
    # Shapes from the regression example: Net(1, 10, 1) on
    # x = torch.unsqueeze(torch.linspace(-1, 1, 100), dim=1) -> (100, 1).
    n_feature, n_hidden, n_output = 1, 10, 1
    N = 100

    key = jax.random.PRNGKey(0)
    k1, k2, k3, k4 = jax.random.split(key, 4)

    # Deterministic parameter init (synthetic, roughly nn.Linear scale).
    w1 = jax.random.uniform(k1, (n_feature, n_hidden), jnp.float32, -1.0, 1.0)
    b1 = jax.random.uniform(k2, (n_hidden,), jnp.float32, -1.0, 1.0)
    w2 = jax.random.uniform(k3, (n_hidden, n_output), jnp.float32, -0.3, 0.3)
    b2 = jax.random.uniform(k4, (n_output,), jnp.float32, -0.3, 0.3)

    # Input: torch.unsqueeze(torch.linspace(-1, 1, 100), dim=1)
    x = jnp.linspace(-1.0, 1.0, N, dtype=jnp.float32).reshape(N, 1)

    out = net_forward(x, w1, b1, w2, b2)
    out = jax.block_until_ready(out)

    ref = net_forward_ref(x, w1, b1, w2, b2)
    assert out.shape == (N, n_output)
    assert jnp.allclose(out, ref, atol=1e-5, rtol=1e-5), "mismatch vs JAX reference"

    print("KERNEL_OK")
</pallas_src>

<mosaic_0001>
module attributes {stable_mosaic.version = 11 : i64} {
  func.func @mlp_kernel(%arg0: memref<1x128xf32, #tpu.memory_space<vmem>>, %arg1: memref<10x1xf32, #tpu.memory_space<vmem>>, %arg2: memref<10x1xf32, #tpu.memory_space<vmem>>, %arg3: memref<10x1xf32, #tpu.memory_space<vmem>>, %arg4: memref<1x1xf32, #tpu.memory_space<smem>>, %arg5: memref<1x128xf32, #tpu.memory_space<vmem>>) attributes {dimension_semantics = [], scalar_prefetch = 0 : i64, scratch_operands = 0 : i64, tpu.core_type = #tpu.core_type<tc>} {
    %c0 = arith.constant 0 : index
    %c0_0 = arith.constant 0 : index
    %0 = vector.load %arg0[%c0, %c0_0] : memref<1x128xf32, #tpu.memory_space<vmem>>, vector<1x128xf32>
    %c0_1 = arith.constant 0 : index
    %c0_2 = arith.constant 0 : index
    %1 = vector.load %arg1[%c0_1, %c0_2] : memref<10x1xf32, #tpu.memory_space<vmem>>, vector<10x1xf32>
    %2 = vector.broadcast %1 : vector<10x1xf32> to vector<10x128xf32>
    %3 = vector.broadcast %0 : vector<1x128xf32> to vector<10x128xf32>
    %4 = arith.mulf %2, %3 : vector<10x128xf32>
    %c0_3 = arith.constant 0 : index
    %c0_4 = arith.constant 0 : index
    %5 = vector.load %arg2[%c0_3, %c0_4] : memref<10x1xf32, #tpu.memory_space<vmem>>, vector<10x1xf32>
    %6 = vector.broadcast %5 : vector<10x1xf32> to vector<10x128xf32>
    %7 = arith.addf %4, %6 : vector<10x128xf32>
    %cst = arith.constant 0.000000e+00 : f32
    %8 = vector.broadcast %cst : f32 to vector<10x128xf32>
    %9 = arith.maximumf %7, %8 : vector<10x128xf32>
    %c0_5 = arith.constant 0 : index
    %c0_6 = arith.constant 0 : index
    %10 = vector.load %arg3[%c0_5, %c0_6] : memref<10x1xf32, #tpu.memory_space<vmem>>, vector<10x1xf32>
    %11 = vector.broadcast %10 : vector<10x1xf32> to vector<10x128xf32>
    %12 = arith.mulf %9, %11 : vector<10x128xf32>
    %cst_7 = arith.constant dense<0.000000e+00> : vector<128xf32>
    %13 = vector.multi_reduction <add>, %12, %cst_7 [0] : vector<10x128xf32> to vector<128xf32>
    %14 = vector.shape_cast %13 : vector<128xf32> to vector<1x128xf32>
    %c0_8 = arith.constant 0 : index
    %c0_9 = arith.constant 0 : index
    %15 = memref.load %arg4[%c0_8, %c0_9] : memref<1x1xf32, #tpu.memory_space<smem>>
    %16 = vector.broadcast %15 : f32 to vector<1x128xf32>
    %17 = arith.addf %14, %16 : vector<1x128xf32>
    %c0_10 = arith.constant 0 : index
    %c0_11 = arith.constant 0 : index
    %18 = vector.load %arg5[%c0_10, %c0_11] : memref<1x128xf32, #tpu.memory_space<vmem>>, vector<1x128xf32>
    tpu.vector_store %arg5[%c0_10, %c0_11], %17 {strides = array<i32>} : memref<1x128xf32, #tpu.memory_space<vmem>>, vector<1x128xf32>,
    return
  }
}

</mosaic_0001>

<bundles_post_ra>
// kernel: tpu_custom_call.1
= control target key start
LH: loop header
LB: loop body
LE: loop exit
PB: predicated region body
PF: predicated region fallthrough
CT: control target
= control target key end

     0   :  { %v129_v2 = vmov 0   ;;  %s197_s0 = inlined_call_operand.vmem [shape: f32[1,128], index: 0, kind: input, shape index: {}]   ;;  %s198_s1 = inlined_call_operand.vmem [shape: f32[10,1], index: 1, kind: input, shape index: {}]   ;;  %s199_s2 = inlined_call_operand.vmem [shape: f32[10,1], index: 2, kind: input, shape index: {}]   ;;  %s200_s3 = inlined_call_operand.vmem [shape: f32[10,1], index: 3, kind: input, shape index: {}]   ;;  %s201_s4 = inlined_call_operand.<no memory space> [shape: f32[1,1], index: 4, kind: input, shape index: {}]   ;;  %s202_s5 = inlined_call_operand.hbm [shape: f32[1,128], index: 5, kind: output, shape index: {}]  }
   0x1   :  { %v44_v0 = vld [vmem:[%s199_s2 + $0x8] sm:$0x3]  ;;  %104 = vset.pattern.permute.xlu1 %v129_v2  ;;  %103 = vset.pattern.permute.xlu0 %v129_v2 }
   0x2   :  { %v24_v1 = vld [vmem:[%s198_s1 + $0x8] sm:$0x3]  ;;  %52 = vperm.xlu1 %104, %v44_v0  }
   0x3   :  { %32 = vperm.xlu0 %103, %v24_v1  }
   0x4   :  { %11 = vsyncpa [#allocation4], 0  ;;  %v43_v3 = vld [vmem:[%s199_s2] sm:$0xff]  ;;  %v60_v6 = vld [vmem:[%s200_s3 + $0x8] sm:$0x3]  ;;  %vm73_vm0 = vcmask 1041408   ;;  %v83_v29 = vstv %s201_s4 }
   0x5   :  { %v23_v4 = vld [vmem:[%s198_s1] sm:$0xff]  ;;  %s130_s2 = smov [#allocation3]  }
   0x6   :  { %47 = vperm.xlu1 %104, %v43_v3   ;;  %v59_v5 = vld [vmem:[%s200_s3] sm:$0xff]  ;;  %s92_s3 = sshll.u32 %s130_s2, 4  ;;  %s93_s3 = int_to_ptr.vmem [resolvable:$true] %s92_s3 }
   0x7   :  { %27 = vperm.xlu0 %103, %v23_v4   ;;  %v100_v7 = vld [vmem:[%s197_s0] ss:$0 sm:$0xff]  ;;  %s105_s7 = scalar_lea.vmem %s93_s3, 16  ;;  %s109_s8 = scalar_lea.vmem %s93_s3, 32 }
   0x8   :  { %p106_p0 = scmp.ne.s32.totalorder %s93_s3, %s105_s7  ;;  %p110_p1 = scmp.lt.s32.totalorder %s93_s3, %s93_s3 }
   0x9   :  { %p111_p2 = scmp.lt.s32.totalorder %s109_s8, %s105_s7 }
   0xa   :  { %63 = vperm.xlu1 %104, %v59_v5  }
   0xb   :  { %68 = vperm.xlu0 %103, %v60_v6   ;;  %p112_p3 = por %p111_p2, %p110_p1 }
   0xd   :  { %p113_p4 = pnand %p112_p3, %p106_p0 }
  0x81   :  { %v53_v8 = vpop.permute.xlu1 %52 }
  0x82   :  { %v33_v9 = vpop.permute.xlu0 %32 }
  0x83   :  { %v42_v10 = vmul.f32 %v100_v7, %v33_v9 }
  0x85   :  { %v56_v11 = vadd.f32 %v53_v8, %v42_v10  ;;  %v48_v12 = vpop.permute.xlu1 %47 }
  0x86   :  { %v28_v13 = vpop.permute.xlu0 %27 }
  0x87   :  { %v41_v14 = vmul.f32 %v100_v7, %v28_v13  ;;  %v58_v16 = vmax.f32 %v56_v11, 0.0 }
  0x89   :  { %v55_v15 = vadd.f32 %v48_v12, %v41_v14  ;;  %v64_v20 = vpop.permute.xlu1 %63 }
  0x8a   :  { %v69_v17 = vpop.permute.xlu0 %68 }
  0x8b   :  { %v57_v18 = vmax.f32 %v55_v15, 0.0  ;;  %v72_v19 = vmul.f32 %v69_v17, %v58_v16 }
  0x8d   :  { %v71_v21 = vmul.f32 %v64_v20, %v57_v18  ;;  %v74_v22 = vsel %vm73_vm0, %v72_v19, 0.0 }
  0x8f   :  { %v75_v23 = vadd.f32 %v74_v22, %v71_v21 }
  0x91   :  { %v76_v24 = vrot.slane %v75_v23, 4 }
  0x93   :  { %v77_v25 = vadd.f32 %v76_v24, %v75_v23 }
  0x95   :  { %v78_v26 = vrot.slane %v77_v25, 2 }
  0x97   :  { %v79_v27 = vadd.f32 %v78_v26, %v77_v25 }
  0x99   :  { %v80_v28 = vrot.slane %v79_v27, 1 }
  0x9b   :  { %v81_v30 = vadd.f32 %v80_v28, %v79_v27 }
  0x9d   :  { %v84_v31 = vadd.f32 %v83_v29, %v81_v30 }
  0x9f   :  { %85 = vst [vmem:[#allocation3] sm:$0x1] %v84_v31 }
  0xa0   :  { %116 = shalt.err (!%p113_p4)
}
  0xa1   :  { %s117_s11 = scalar_lea.hbm %s202_s5, 16 }
  0xa2   :  { %p118_p5 = scmp.ne.s32.totalorder %s202_s5, %s117_s11  ;;  %p121_p6 = scmp.lt.u32.totalorder %s117_s11, %s202_s5 }
  0xa4   :  { %p123_p7 = pnand %p121_p6, %p118_p5 }
  0xa6   :  { %126 = shalt.err (!%p123_p7)
}
  0xa7   :  { %95 = dma.vmem_to_hbm [thread:$0]  %s93_s3, 16, %s202_s5, [#allocation4]  }
  0xa8   :  { %127 = dma.done.wait [#allocation4], 16  }
  0xa9   :  { %128 = vsyncadd [#allocation4], 4294967280 }
  0xaa   :  { %99 = vsyncpa [#allocation4], 1 }

</bundles_post_ra>
